<compile_context>
chip_gen: v7x
topology: tpu7x:2x2x1
jax: 0.10.0
libtpu: 0.0.40
codegen_flags: <defaults>
</compile_context>

<pallas_src>
import jax
import jax.numpy as jnp
from jax.experimental import pallas as pl
from jax.experimental.pallas import tpu as pltpu


def mlp_kernel(x_ref, w1_ref, b1_ref, w2_ref, b2_ref, w3_ref, b3_ref,
               w4_ref, b4_ref, o_ref):
    # x_ref:   (din, bt)      -- batch on lanes
    # w1..w3:  (dout, din)    b1..b3: (dout, 1)
    # w4:      (16, 1)        b4:     (1, 1)
    # o_ref:   (1, bt)        -- lane-dense output (batch on lanes)
    x = x_ref[...]

    h = jnp.dot(w1_ref[...], x, preferred_element_type=jnp.float32) + b1_ref[...]
    h = jnp.maximum(h, 0.0)

    h = jnp.dot(w2_ref[...], h, preferred_element_type=jnp.float32) + b2_ref[...]
    h = jnp.maximum(h, 0.0)

    h = jnp.dot(w3_ref[...], h, preferred_element_type=jnp.float32) + b3_ref[...]
    h = jnp.maximum(h, 0.0)

    # fc4 (output_dim == 1): VPU multiply + sublane reduce -> no MXU round trip.
    o = jnp.sum(h * w4_ref[...], axis=0, keepdims=True) + b4_ref[...]
    o_ref[...] = o.astype(o_ref.dtype)


def _pick_batch_tile(batch):
    # Lane-dense (multiple of 128), large enough to amortize per-step overhead,
    # and >= 2 grid steps whenever the batch allows (v7x has 2 TensorCores).
    return int(min(512, max(128, ((batch // 2) // 128) * 128)))


def mlp_forward(x, params, *, batch_tile=None):
    """x: [B, input_dim] float32  ->  [B, output_dim] float32."""
    B, din = x.shape
    w1, b1 = params["fc1"]
    w2, b2 = params["fc2"]
    w3, b3 = params["fc3"]
    w4, b4 = params["fc4"]
    dout = w4.shape[1]
    assert dout == 1, "kernel specializes the N==1 final layer (BenchmarkModel default)"

    if batch_tile is None:
        batch_tile = _pick_batch_tile(B)
    assert batch_tile % 128 == 0, "batch_tile must be a multiple of 128 (lane width)"

    n_tiles = (B + batch_tile - 1) // batch_tile
    Bp = n_tiles * batch_tile

    # Pad ragged batches; padded zero rows flow through harmlessly and are sliced off.
    x_t = jnp.pad(x, ((0, Bp - B), (0, 0))).T  # (din, Bp), batch on lanes

    def full_spec(arr):
        # Small weights/biases: fully resident every grid step.
        return pl.BlockSpec(arr.shape, lambda i: (0, 0))

    flops = 2 * Bp * (din * 64 + 64 * 32 + 32 * 16 + 16 * dout)
    bytes_accessed = (
        x_t.size * 4 + Bp * dout * 4
        + sum(int(a.size) * 4 for a in (w1, b1, w2, b2, w3, b3, w4, b4)))

    out = pl.pallas_call(
        mlp_kernel,
        out_shape=jax.ShapeDtypeStruct((1, Bp), jnp.float32),
        grid_spec=pltpu.PrefetchScalarGridSpec(
            num_scalar_prefetch=0,
            grid=(n_tiles,),
            in_specs=[
                pl.BlockSpec((din, batch_tile), lambda i: (0, i)),
                full_spec(w1), full_spec(b1),
                full_spec(w2), full_spec(b2),
                full_spec(w3), full_spec(b3),
                full_spec(w4), full_spec(b4),
            ],
            out_specs=pl.BlockSpec((1, batch_tile), lambda i: (0, i)),
        ),
        compiler_params=pltpu.CompilerParams(
            dimension_semantics=("parallel",)),
        cost_estimate=pl.CostEstimate(
            flops=flops, transcendentals=0, bytes_accessed=bytes_accessed),
    )(x_t, w1, b1, w2, b2, w3, b3, w4, b4)

    return out.reshape(Bp, 1)[:B]


def init_params(key, input_dim=8, output_dim=1):
    """Deterministic init mirroring nn.Linear: fc1-fc3 stored (out, in); fc4 as (in, 1)."""
    layer_dims = [(input_dim, 64), (64, 32), (32, 16), (16, output_dim)]
    names = ["fc1", "fc2", "fc3", "fc4"]
    params = {}
    for name, (d_in, d_out) in zip(names, layer_dims):
        key, kw, kb = jax.random.split(key, 3)
        bound = 1.0 / float(d_in) ** 0.5
        if name == "fc4":
            w = jax.random.uniform(kw, (d_in, d_out), jnp.float32, -bound, bound)  # (16, 1)
            b = jax.random.uniform(kb, (1, d_out), jnp.float32, -bound, bound)     # (1, 1)
        else:
            w = jax.random.uniform(kw, (d_out, d_in), jnp.float32, -bound, bound)  # (out, in)
            b = jax.random.uniform(kb, (d_out, 1), jnp.float32, -bound, bound)     # (out, 1)
        params[name] = (w, b)
    return params


def mlp_reference(x, params):
    h = x
    for name in ("fc1", "fc2", "fc3"):
        w, b = params[name]              # (out, in), (out, 1)
        h = jnp.maximum(h @ w.T + b.T, 0.0)
    w4, b4 = params["fc4"]               # (16, 1), (1, 1)
    return h @ w4 + b4


if __name__ == "__main__":
    key = jax.random.PRNGKey(0)
    key, kx1, kx2 = jax.random.split(key, 3)

    input_dim, output_dim = 8, 1
    params = init_params(key, input_dim, output_dim)

    # Small ragged batch (exercises the padding path, single grid step).
    x_small = jax.random.normal(kx1, (16, input_dim), jnp.float32)
    out_small = jax.block_until_ready(mlp_forward(x_small, params))
    ref_small = mlp_reference(x_small, params)
    assert out_small.shape == (16, output_dim)
    assert jnp.allclose(out_small, ref_small, atol=1e-5, rtol=1e-5)

    # Larger batch (exercises a multi-step grid: 2 x 128-row lane-dense tiles).
    x_big = jax.random.normal(kx2, (256, input_dim), jnp.float32)
    out_big = jax.block_until_ready(mlp_forward(x_big, params))
    ref_big = mlp_reference(x_big, params)
    assert out_big.shape == (256, output_dim)
    assert jnp.allclose(out_big, ref_big, atol=1e-5, rtol=1e-5)

    print("KERNEL_OK")
</pallas_src>

<mosaic_0001>
module attributes {stable_mosaic.version = 11 : i64} {
  func.func @mlp_kernel(%arg0: i32, %arg1: memref<8x128xf32, #tpu.memory_space<vmem>>, %arg2: memref<64x8xf32, #tpu.memory_space<vmem>>, %arg3: memref<64x1xf32, #tpu.memory_space<vmem>>, %arg4: memref<32x64xf32, #tpu.memory_space<vmem>>, %arg5: memref<32x1xf32, #tpu.memory_space<vmem>>, %arg6: memref<16x32xf32, #tpu.memory_space<vmem>>, %arg7: memref<16x1xf32, #tpu.memory_space<vmem>>, %arg8: memref<16x1xf32, #tpu.memory_space<vmem>>, %arg9: memref<1x1xf32, #tpu.memory_space<vmem>>, %arg10: memref<1x128xf32, #tpu.memory_space<vmem>>) attributes {dimension_semantics = [#tpu.dimension_semantics<parallel>], iteration_bounds = array<i64: 1>, scalar_prefetch = 0 : i64, scratch_operands = 0 : i64, tpu.core_type = #tpu.core_type<tc>, window_params = [{transform_indices = @transform_0, window_bounds = array<i64: 8, 128>}, {pipeline_mode = #tpu.pipeline_mode<synchronous>, transform_indices = @transform_1, window_bounds = array<i64: 64, 8>}, {pipeline_mode = #tpu.pipeline_mode<synchronous>, transform_indices = @transform_2, window_bounds = array<i64: 64, 1>}, {pipeline_mode = #tpu.pipeline_mode<synchronous>, transform_indices = @transform_3, window_bounds = array<i64: 32, 64>}, {pipeline_mode = #tpu.pipeline_mode<synchronous>, transform_indices = @transform_4, window_bounds = array<i64: 32, 1>}, {pipeline_mode = #tpu.pipeline_mode<synchronous>, transform_indices = @transform_5, window_bounds = array<i64: 16, 32>}, {pipeline_mode = #tpu.pipeline_mode<synchronous>, transform_indices = @transform_6, window_bounds = array<i64: 16, 1>}, {pipeline_mode = #tpu.pipeline_mode<synchronous>, transform_indices = @transform_7, window_bounds = array<i64: 16, 1>}, {pipeline_mode = #tpu.pipeline_mode<synchronous>, transform_indices = @transform_8, window_bounds = array<i64: 1, 1>}, {transform_indices = @transform_9, window_bounds = array<i64: 1, 128>}]} {
    %c0 = arith.constant 0 : index
    %c0_0 = arith.constant 0 : index
    %0 = vector.load %arg1[%c0, %c0_0] : memref<8x128xf32, #tpu.memory_space<vmem>>, vector<8x128xf32>
    %c0_1 = arith.constant 0 : index
    %c0_2 = arith.constant 0 : index
    %1 = vector.load %arg2[%c0_1, %c0_2] : memref<64x8xf32, #tpu.memory_space<vmem>>, vector<64x8xf32>
    %cst = arith.constant dense<0.000000e+00> : vector<64x128xf32>
    %2 = tpu.matmul %1, %0, %cst {dimension_numbers = #tpu.dot_dimension_numbers<[1], [0], [0], [1], [0, 0, 1, 1], [], []>} : vector<64x8xf32>, vector<8x128xf32>, vector<64x128xf32> -> vector<64x128xf32>
    %c0_3 = arith.constant 0 : index
    %c0_4 = arith.constant 0 : index
    %3 = vector.load %arg3[%c0_3, %c0_4] : memref<64x1xf32, #tpu.memory_space<vmem>>, vector<64x1xf32>
    %4 = vector.broadcast %3 : vector<64x1xf32> to vector<64x128xf32>
    %5 = arith.addf %2, %4 : vector<64x128xf32>
    %cst_5 = arith.constant 0.000000e+00 : f32
    %6 = vector.broadcast %cst_5 : f32 to vector<64x128xf32>
    %7 = arith.maximumf %5, %6 : vector<64x128xf32>
    %c0_6 = arith.constant 0 : index
    %c0_7 = arith.constant 0 : index
    %8 = vector.load %arg4[%c0_6, %c0_7] : memref<32x64xf32, #tpu.memory_space<vmem>>, vector<32x64xf32>
    %cst_8 = arith.constant dense<0.000000e+00> : vector<32x128xf32>
    %9 = tpu.matmul %8, %7, %cst_8 {dimension_numbers = #tpu.dot_dimension_numbers<[1], [0], [0], [1], [0, 0, 1, 1], [], []>} : vector<32x64xf32>, vector<64x128xf32>, vector<32x128xf32> -> vector<32x128xf32>
    %c0_9 = arith.constant 0 : index
    %c0_10 = arith.constant 0 : index
    %10 = vector.load %arg5[%c0_9, %c0_10] : memref<32x1xf32, #tpu.memory_space<vmem>>, vector<32x1xf32>
    %11 = vector.broadcast %10 : vector<32x1xf32> to vector<32x128xf32>
    %12 = arith.addf %9, %11 : vector<32x128xf32>
    %cst_11 = arith.constant 0.000000e+00 : f32
    %13 = vector.broadcast %cst_11 : f32 to vector<32x128xf32>
    %14 = arith.maximumf %12, %13 : vector<32x128xf32>
    %c0_12 = arith.constant 0 : index
    %c0_13 = arith.constant 0 : index
    %15 = vector.load %arg6[%c0_12, %c0_13] : memref<16x32xf32, #tpu.memory_space<vmem>>, vector<16x32xf32>
    %cst_14 = arith.constant dense<0.000000e+00> : vector<16x128xf32>
    %16 = tpu.matmul %15, %14, %cst_14 {dimension_numbers = #tpu.dot_dimension_numbers<[1], [0], [0], [1], [0, 0, 1, 1], [], []>} : vector<16x32xf32>, vector<32x128xf32>, vector<16x128xf32> -> vector<16x128xf32>
    %c0_15 = arith.constant 0 : index
    %c0_16 = arith.constant 0 : index
    %17 = vector.load %arg7[%c0_15, %c0_16] : memref<16x1xf32, #tpu.memory_space<vmem>>, vector<16x1xf32>
    %18 = vector.broadcast %17 : vector<16x1xf32> to vector<16x128xf32>
    %19 = arith.addf %16, %18 : vector<16x128xf32>
    %cst_17 = arith.constant 0.000000e+00 : f32
    %20 = vector.broadcast %cst_17 : f32 to vector<16x128xf32>
    %21 = arith.maximumf %19, %20 : vector<16x128xf32>
    %c0_18 = arith.constant 0 : index
    %c0_19 = arith.constant 0 : index
    %22 = vector.load %arg8[%c0_18, %c0_19] : memref<16x1xf32, #tpu.memory_space<vmem>>, vector<16x1xf32>
    %23 = vector.broadcast %22 : vector<16x1xf32> to vector<16x128xf32>
    %24 = arith.mulf %21, %23 : vector<16x128xf32>
    %cst_20 = arith.constant dense<0.000000e+00> : vector<128xf32>
    %25 = vector.multi_reduction <add>, %24, %cst_20 [0] : vector<16x128xf32> to vector<128xf32>
    %26 = vector.shape_cast %25 : vector<128xf32> to vector<1x128xf32>
    %c0_21 = arith.constant 0 : index
    %c0_22 = arith.constant 0 : index
    %27 = vector.load %arg9[%c0_21, %c0_22] : memref<1x1xf32, #tpu.memory_space<vmem>>, vector<1x1xf32>
    %28 = vector.broadcast %27 : vector<1x1xf32> to vector<1x128xf32>
    %29 = arith.addf %26, %28 : vector<1x128xf32>
    %c0_23 = arith.constant 0 : index
    %c0_24 = arith.constant 0 : index
    %30 = vector.load %arg10[%c0_23, %c0_24] : memref<1x128xf32, #tpu.memory_space<vmem>>, vector<1x128xf32>
    tpu.vector_store %arg10[%c0_23, %c0_24], %29 {strides = array<i32>} : memref<1x128xf32, #tpu.memory_space<vmem>>, vector<1x128xf32>,
    return
  }
  func.func @transform_0(%arg0: i32) -> (i32, i32) {
    %c0_i32 = arith.constant 0 : i32
    %c0_i32_0 = arith.constant 0 : i32
    return %c0_i32, %arg0 : i32, i32
  }
  func.func @transform_1(%arg0: i32) -> (i32, i32) {
    %c0_i32 = arith.constant 0 : i32
    %c0_i32_0 = arith.constant 0 : i32
    %c0_i32_1 = arith.constant 0 : i32
    return %c0_i32, %c0_i32_0 : i32, i32
  }
  func.func @transform_2(%arg0: i32) -> (i32, i32) {
    %c0_i32 = arith.constant 0 : i32
    %c0_i32_0 = arith.constant 0 : i32
    %c0_i32_1 = arith.constant 0 : i32
    return %c0_i32, %c0_i32_0 : i32, i32
  }
  func.func @transform_3(%arg0: i32) -> (i32, i32) {
    %c0_i32 = arith.constant 0 : i32
    %c0_i32_0 = arith.constant 0 : i32
    %c0_i32_1 = arith.constant 0 : i32
    return %c0_i32, %c0_i32_0 : i32, i32
  }
  func.func @transform_4(%arg0: i32) -> (i32, i32) {
    %c0_i32 = arith.constant 0 : i32
    %c0_i32_0 = arith.constant 0 : i32
    %c0_i32_1 = arith.constant 0 : i32
    return %c0_i32, %c0_i32_0 : i32, i32
  }
  func.func @transform_5(%arg0: i32) -> (i32, i32) {
    %c0_i32 = arith.constant 0 : i32
    %c0_i32_0 = arith.constant 0 : i32
    %c0_i32_1 = arith.constant 0 : i32
    return %c0_i32, %c0_i32_0 : i32, i32
  }
  func.func @transform_6(%arg0: i32) -> (i32, i32) {
    %c0_i32 = arith.constant 0 : i32
    %c0_i32_0 = arith.constant 0 : i32
    %c0_i32_1 = arith.constant 0 : i32
    return %c0_i32, %c0_i32_0 : i32, i32
  }
  func.func @transform_7(%arg0: i32) -> (i32, i32) {
    %c0_i32 = arith.constant 0 : i32
    %c0_i32_0 = arith.constant 0 : i32
    %c0_i32_1 = arith.constant 0 : i32
    return %c0_i32, %c0_i32_0 : i32, i32
  }
  func.func @transform_8(%arg0: i32) -> (i32, i32) {
    %c0_i32 = arith.constant 0 : i32
    %c0_i32_0 = arith.constant 0 : i32
    %c0_i32_1 = arith.constant 0 : i32
    return %c0_i32, %c0_i32_0 : i32, i32
  }
  func.func @transform_9(%arg0: i32) -> (i32, i32) {
    %c0_i32 = arith.constant 0 : i32
    %c0_i32_0 = arith.constant 0 : i32
    return %c0_i32, %arg0 : i32, i32
  }
}

</mosaic_0001>

<bundles_post_ra>
// kernel: tpu_custom_call.1
= control target key start
LH: loop header
LB: loop body
LE: loop exit
PB: predicated region body
PF: predicated region fallthrough
CT: control target
= control target key end

     0   :  { %s819_s0 = inlined_call_operand.vmem [shape: f32[8,128], index: 0, kind: input, shape index: {}]   ;;  %s820_s1 = inlined_call_operand.vmem [shape: f32[64,8], index: 1, kind: input, shape index: {}]   ;;  %s821_s2 = inlined_call_operand.vmem [shape: f32[64,1], index: 2, kind: input, shape index: {}]   ;;  %s822_s3 = inlined_call_operand.vmem [shape: f32[32,64], index: 3, kind: input, shape index: {}]   ;;  %s823_s4 = inlined_call_operand.vmem [shape: f32[32,1], index: 4, kind: input, shape index: {}]   ;;  %s824_s5 = inlined_call_operand.vmem [shape: f32[16,32], index: 5, kind: input, shape index: {}]   ;;  %s825_s6 = inlined_call_operand.vmem [shape: f32[16,1], index: 6, kind: input, shape index: {}]   ;;  %s826_s7 = inlined_call_operand.vmem [shape: f32[16,1], index: 7, kind: input, shape index: {}]   ;;  %s827_s8 = inlined_call_operand.<no memory space> [shape: f32[1,1], index: 8, kind: input, shape index: {}]   ;;  %s828_s9 = inlined_call_operand.hbm [shape: f32[1,128], index: 9, kind: output, shape index: {}]  }
   0x1   :  { %v14_v0 = vstv %s827_s8 }
   0x2   :  { %15 = vst [vmem:[#allocation2] sm:$0x1] %v14_v0 }
   0x3   :  { %v35_v1 = vld [vmem:[%s819_s0] sm:$0xff]  ;;  %vm92_vm0 = vcmask 64512   ;;  %v37_v3 = vld [vmem:[%s820_s1 + $0x8] sm:$0xff]  ;;  %v38_v4 = vld [vmem:[%s820_s1 + $0x10] sm:$0xff]  ;;  %v645_v5 = vmov 0  }
   0x4   :  { %v36_v2 = vld [vmem:[%s820_s1] sm:$0xff]  ;;  %546 = vmatprep.subr.mxu0 %v35_v1  ;;  %619 = vset.pattern.permute.xlu0 %v645_v5  ;;  %v46_v7 = vld [vmem:[%s821_s2 + $0x10] sm:$0xff]  ;;  %v39_v8 = vld [vmem:[%s820_s1 + $0x18] sm:$0xff] }
   0x5   :  { %548 = vmatprep.mubr.msk.f32.mxu0 %vm92_vm0, %v36_v2  ;;  %547 = vmatpush3.msra.mxu0 %v35_v1  ;;  %v44_v6 = vld [vmem:[%s821_s2] sm:$0xff]  ;;  %v45_v10 = vld [vmem:[%s821_s2 + $0x8] sm:$0xff]  ;;  %v47_v11 = vld [vmem:[%s821_s2 + $0x18] sm:$0xff] }
   0x6   :  { %549 = vmatmul.mubr.msk.f32.vlgmr.msra.gmra.mrb[0].mxu0 %vm92_vm0, %v37_v3  ;;  %620 = vset.pattern.permute.xlu1 %v645_v5  ;;  %v40_v9 = vld [vmem:[%s820_s1 + $0x20] sm:$0xff]  ;;  %v41_v12 = vld [vmem:[%s820_s1 + $0x28] sm:$0xff] }
   0x7   :  { %551 = vmatprep.mubr.msk.f32.mxu0 %vm92_vm0, %v38_v4  ;;  %54 = vperm.xlu0 %619, %v44_v6  }
   0x8   :  { %64 = vperm.xlu1 %620, %v46_v7  }
   0xa   :  { %552 = vmatmul.mubr.msk.f32.gmra.mrb[2].mxu0 %vm92_vm0, %v39_v8 }
   0xb   :  { %554 = vmatprep.mubr.msk.f32.mxu0 %vm92_vm0, %v40_v9  ;;  %59 = vperm.xlu0 %619, %v45_v10  }
   0xc   :  { %16 = vsyncpa [#allocation4], 0  ;;  %v42_v13 = vld [vmem:[%s820_s1 + $0x30] sm:$0xff]  ;;  %v48_v14 = vld [vmem:[%s821_s2 + $0x20] sm:$0xff]  ;;  %69 = vperm.xlu1 %620, %v47_v11   ;;  %vm258_vm1 = vcmask 523264   ;;  %vm374_vm2 = vcmask 261120  }
   0xd   :  { %v49_v15 = vld [vmem:[%s821_s2 + $0x28] sm:$0xff]  ;;  %v43_v16 = vld [vmem:[%s820_s1 + $0x38] sm:$0xff]  ;;  %v50_v17 = vld [vmem:[%s821_s2 + $0x30] sm:$0xff] }
   0xe   :  { %555 = vmatmul.mubr.msk.f32.gmra.mrb[4].mxu0 %vm92_vm0, %v41_v12  ;;  %v51_v18 = vld [vmem:[%s821_s2 + $0x38] sm:$0xff]  ;;  %v234_v19 = vld [vmem:[%s823_s4] sm:$0xff]  ;;  %v235_v20 = vld [vmem:[%s823_s4 + $0x8] sm:$0xff] }
   0xf   :  { %557 = vmatprep.mubr.msk.f32.mxu0 %vm92_vm0, %v42_v13  ;;  %74 = vperm.xlu0 %619, %v48_v14   ;;  %v236_v21 = vld [vmem:[%s823_s4 + $0x10] sm:$0xff]  ;;  %v237_v22 = vld [vmem:[%s823_s4 + $0x18] sm:$0xff]  ;;  %v362_v23 = vld [vmem:[%s825_s6] sm:$0xff] }
  0x10   :  { %79 = vperm.xlu1 %620, %v49_v15   ;;  %v363_v24 = vld [vmem:[%s825_s6 + $0x8] sm:$0xff]  ;;  %v458_v25 = vld [vmem:[%s826_s7] sm:$0xff]  ;;  %v232_v2 = vld [vmem:[%s822_s3 + $0x10] sm:$0xff] }
  0x11   :  { %v459_v26 = vld [vmem:[%s826_s7 + $0x8] sm:$0xff]  ;;  %v479_v27 = vld [vmem:[#allocation2] sm:$0x1]  ;;  %v233_v3 = vld [vmem:[%s822_s3 + $0x18] sm:$0xff] }
  0x12   :  { %558 = vmatmul.mubr.msk.f32.gmra.mrb[6].mxu0 %vm92_vm0, %v43_v16  ;;  %v230_v28 = vld [vmem:[%s822_s3] sm:$0xff]  ;;  %v231_v1 = vld [vmem:[%s822_s3 + $0x8] sm:$0xff] }
  0x13   :  { %84 = vperm.xlu0 %619, %v50_v17   ;;  %576 = vmatprep.mubr.msk.f32.mxu1 %vm258_vm1, %v230_v28  ;;  %v360_v4 = vld [vmem:[%s824_s5] sm:$0xff] }
  0x14   :  { %89 = vperm.xlu1 %620, %v51_v18   ;;  %590 = vmatprep.mubr.msk.f32.mxu0 %vm374_vm2, %v360_v4 }
  0x17   :  { %240 = vperm.xlu0 %619, %v234_v19  }
  0x18   :  { %245 = vperm.xlu1 %620, %v235_v20  }
  0x1b   :  { %250 = vperm.xlu0 %619, %v236_v21  }
  0x1c   :  { %255 = vperm.xlu1 %620, %v237_v22  }
  0x1f   :  { %366 = vperm.xlu0 %619, %v362_v23   ;;  %v361_v23 = vld [vmem:[%s824_s5 + $0x8] sm:$0xff]  ;;  %s646_s5 = smov [#allocation3]  }
  0x20   :  { %371 = vperm.xlu1 %620, %v363_v24   ;;  %s497_s19 = sshll.u32 %s646_s5, 4  ;;  %s498_s19 = int_to_ptr.vmem [resolvable:$true] %s497_s19 }
  0x21   :  { %s621_s20 = scalar_lea.vmem %s498_s19, 16  ;;  %s625_s21 = scalar_lea.vmem %s498_s19, 32 }
  0x22   :  { %p622_p0 = scmp.ne.s32.totalorder %s498_s19, %s621_s20  ;;  %p626_p1 = scmp.lt.s32.totalorder %s498_s19, %s498_s19 }
  0x23   :  { %462 = vperm.xlu0 %619, %v458_v25   ;;  %p627_p2 = scmp.lt.s32.totalorder %s625_s21, %s621_s20 }
  0x24   :  { %467 = vperm.xlu1 %620, %v459_v26  }
  0x25   :  { %p628_p3 = por %p627_p2, %p626_p1 }
  0x27   :  { %482 = vperm.xlu0 %619, %v479_v27   ;;  %p629_p4 = pnand %p628_p3, %p622_p0 }
  0x86   :  { %v55_v29 = vpop.permute.xlu0 %54 }
  0x87   :  { %v65_v30 = vpop.permute.xlu1 %64 }
  0x8a   :  { %v60_v31 = vpop.permute.xlu0 %59 }
  0x8b   :  { %v70_v32 = vpop.permute.xlu1 %69 }
  0x8e   :  { %v75_v45 = vpop.permute.xlu0 %74 }
  0x8f   :  { %v80_v42 = vpop.permute.xlu1 %79 }
  0x92   :  { %v85_v57 = vpop.permute.xlu0 %84 }
  0x93   :  { %v90_v54 = vpop.permute.xlu1 %89 }
  0x96   :  { %v241_v6 = vpop.permute.xlu0 %240 }
  0x97   :  { %v246_v5 = vpop.permute.xlu1 %245 }
  0x9a   :  { %v251_v15 = vpop.permute.xlu0 %250 }
  0x9b   :  { %v256_v12 = vpop.permute.xlu1 %255 }
  0x9e   :  { %v367_v25 = vpop.permute.xlu0 %366 }
  0x9f   :  { %v372_v24 = vpop.permute.xlu1 %371 }
  0xd9   :  { %v550_v33 = vpop.f32.mrb[0].mxu0 }
  0xda   :  { %v189_v34 = vadd.f32 %v550_v33, %v60_v31  ;;  %v183_v35 = vpop.f32.mrb[1].mxu0  ;;  %v468_v31 = vpop.permute.xlu1 %467 }
  0xdb   :  { %v184_v36 = vadd.f32 %v183_v35, %v55_v29  ;;  %v463_v33 = vpop.permute.xlu0 %462 }
  0xdc   :  { %v223_v37 = vmax.f32 %v189_v34, 0.0 }
  0xdd   :  { %v222_v38 = vmax.f32 %v184_v36, 0.0  ;;  %v553_v39 = vpop.f32.mrb[2].mxu0  ;;  %v485_v36 = vlaneseq }
  0xde   :  { %v199_v40 = vadd.f32 %v553_v39, %v70_v32  ;;  %v193_v41 = vpop.f32.mrb[3].mxu0 }
  0xdf   :  { %v194_v43 = vadd.f32 %v193_v41, %v65_v30  ;;  %v593_v44 = vpack.c.bf16 %v223_v37, %v222_v38  ;;  %v486_v39 = vshrl.u32 %v485_v36, 7 }
  0xe0   :  { %v225_v46 = vmax.f32 %v199_v40, 0.0 }
  0xe1   :  { %v224_v47 = vmax.f32 %v194_v43, 0.0  ;;  %v556_v48 = vpop.f32.mrb[4].mxu0  ;;  %594 = vmatprep.subr.bf16.mxu1 %v593_v44 }
  0xe2   :  { %v209_v49 = vadd.f32 %v556_v48, %v80_v42  ;;  %v203_v50 = vpop.f32.mrb[5].mxu0  ;;  %596 = vmatpush3.bf16.msra.mxu1 %v593_v44  ;;  %v487_v42 = vsub.s32 0, %v486_v39  ;;  %v483_v44 = vpop.permute.xlu0 %482 }
  0xe3   :  { %v597_v51 = vpack.c.bf16 %v225_v46, %v224_v47  ;;  %v204_v52 = vadd.f32 %v203_v50, %v75_v45 }
  0xe4   :  { %v227_v53 = vmax.f32 %v209_v49, 0.0  ;;  %v488_v46 = vrot.slane %v483_v44, %v487_v42 }
  0xe5   :  { %v226_v55 = vmax.f32 %v204_v52, 0.0  ;;  %v559_v56 = vpop.f32.mrb[6].mxu0  ;;  %598 = vmatprep.subr.bf16.mxu1 %v597_v51 }
  0xe6   :  { %v219_v58 = vadd.f32 %v559_v56, %v90_v54  ;;  %v213_v59 = vpop.f32.mrb[7].mxu0  ;;  %600 = vmatpush3.bf16.msra.mxu1 %v597_v51 }
  0xe7   :  { %v601_v60 = vpack.c.bf16 %v227_v53, %v226_v55  ;;  %v214_v61 = vadd.f32 %v213_v59, %v85_v57 }
  0xe8   :  { %v229_v62 = vmax.f32 %v219_v58, 0.0 }
  0xe9   :  { %v228_v63 = vmax.f32 %v214_v61, 0.0  ;;  %602 = vmatprep.subr.bf16.mxu1 %v601_v60 }
  0xea   :  { %604 = vmatpush3.bf16.msra.mxu1 %v601_v60 }
  0xeb   :  { %v605_v0 = vpack.c.bf16 %v229_v62, %v228_v63 }
  0xed   :  { %606 = vmatprep.subr.bf16.mxu1 %v605_v0 }
  0xee   :  { %608 = vmatpush3.bf16.msra.mxu1 %v605_v0 }
  0xf1   :  { %577 = vmatmul.mubr.msk.f32.vlgmr.msra.gmra.mrb[0].mxu1 %vm258_vm1, %v231_v1 }
  0xf2   :  { %579 = vmatprep.mubr.msk.f32.mxu1 %vm258_vm1, %v232_v2 }
  0xf5   :  { %580 = vmatmul.mubr.msk.f32.gmra.mrb[2].mxu1 %vm258_vm1, %v233_v3 }
 0x1c4   :  { %v578_v7 = vpop.f32.mrb[0].mxu1 }
 0x1c5   :  { %v343_v8 = vadd.f32 %v578_v7, %v246_v5  ;;  %v337_v9 = vpop.f32.mrb[1].mxu1 }
 0x1c6   :  { %v338_v10 = vadd.f32 %v337_v9, %v241_v6 }
 0x1c7   :  { %v357_v11 = vmax.f32 %v343_v8, 0.0 }
 0x1c8   :  { %v356_v13 = vmax.f32 %v338_v10, 0.0  ;;  %v581_v14 = vpop.f32.mrb[2].mxu1 }
 0x1c9   :  { %v353_v16 = vadd.f32 %v581_v14, %v256_v12  ;;  %v347_v17 = vpop.f32.mrb[3].mxu1 }
 0x1ca   :  { %v609_v18 = vpack.c.bf16 %v357_v11, %v356_v13  ;;  %v348_v19 = vadd.f32 %v347_v17, %v251_v15 }
 0x1cb   :  { %v359_v20 = vmax.f32 %v353_v16, 0.0 }
 0x1cc   :  { %v358_v21 = vmax.f32 %v348_v19, 0.0  ;;  %610 = vmatprep.subr.bf16.mxu0 %v609_v18 }
 0x1cd   :  { %612 = vmatpush3.bf16.msra.mxu0 %v609_v18 }
 0x1ce   :  { %v613_v22 = vpack.c.bf16 %v359_v20, %v358_v21 }
 0x1d0   :  { %614 = vmatprep.subr.bf16.mxu0 %v613_v22 }
 0x1d1   :  { %616 = vmatpush3.bf16.msra.mxu0 %v613_v22 }
 0x1d4   :  { %591 = vmatmul.mubr.msk.f32.vlgmr.msra.gmra.mrb[8].mxu0 %vm374_vm2, %v361_v23 }
 0x2a7   :  { %v592_v26 = vpop.f32.mrb[8].mxu0 }
 0x2a8   :  { %v453_v27 = vadd.f32 %v592_v26, %v372_v24  ;;  %v447_v28 = vpop.f32.mrb[9].mxu0 }
 0x2a9   :  { %v448_v29 = vadd.f32 %v447_v28, %v367_v25 }
 0x2aa   :  { %v457_v30 = vmax.f32 %v453_v27, 0.0 }
 0x2ab   :  { %v456_v32 = vmax.f32 %v448_v29, 0.0 }
 0x2ac   :  { %v471_v34 = vmul.f32 %v468_v31, %v457_v30 }
 0x2ad   :  { %v470_v35 = vmul.f32 %v463_v33, %v456_v32 }
 0x2af   :  { %v472_v37 = vadd.f32 %v471_v34, %v470_v35 }
 0x2b1   :  { %v473_v38 = vrot.slane %v472_v37, 4 }
 0x2b3   :  { %v474_v40 = vadd.f32 %v473_v38, %v472_v37 }
 0x2b5   :  { %v475_v41 = vrot.slane %v474_v40, 2 }
 0x2b7   :  { %v476_v43 = vadd.f32 %v475_v41, %v474_v40 }
 0x2b9   :  { %v477_v45 = vrot.slane %v476_v43, 1 }
 0x2bb   :  { %v478_v47 = vadd.f32 %v477_v45, %v476_v43 }
 0x2bd   :  { %v489_v48 = vadd.f32 %v488_v46, %v478_v47 }
 0x2bf   :  { %490 = vst [vmem:[#allocation3] sm:$0x1] %v489_v48 }
 0x2c0   :  { %632 = shalt.err (!%p629_p4)
}
 0x2c1   :  { %s633_s23 = scalar_lea.hbm %s828_s9, 16 }
 0x2c2   :  { %p634_p5 = scmp.ne.s32.totalorder %s828_s9, %s633_s23  ;;  %p637_p6 = scmp.lt.u32.totalorder %s633_s23, %s828_s9 }
 0x2c4   :  { %p639_p7 = pnand %p637_p6, %p634_p5 }
 0x2c6   :  { %642 = shalt.err (!%p639_p7)
}
 0x2c7   :  { %500 = dma.vmem_to_hbm [thread:$0]  %s498_s19, 16, %s828_s9, [#allocation4]  }
 0x2c8   :  { %643 = dma.done.wait [#allocation4], 16  }
 0x2c9   :  { %644 = vsyncadd [#allocation4], 4294967280 }
 0x2ca   :  { %504 = vsyncpa [#allocation4], 1 }

</bundles_post_ra>
